<compile_context>
chip_gen: v5e
topology: v5e:2x2
jax: 0.10.0
libtpu: 0.0.40
codegen_flags: <defaults>
</compile_context>

<pallas_src>
import functools

import jax
import jax.numpy as jnp
from jax import lax
from jax.experimental import pallas as pl
from jax.experimental.pallas import tpu as pltpu


# Contract the last dim of both operands: x (L, Ein) . w (Eout, Ein) -> (L, Eout)
# i.e. x @ w.T without materializing a transpose.
_CONTRACT_LAST = (((1,), (1,)), ((), ()))


def _fused_sdpa_kernel(t_ref, s_ref, wq_ref, bq_ref, wkv_ref, bkv_ref, m_ref,
                       o_ref, *, num_heads, scale):
    # t_ref:  (T, E)        target activations (compute dtype)
    # s_ref:  (S, E)        source activations (compute dtype)
    # wq_ref: (E, E)    bq_ref: (1, E)
    # wkv_ref:(2E, E)   bkv_ref:(1, 2E)
    # m_ref:  (1, S) int32  (1 = attend, 0 = masked)
    # o_ref:  (T, E)        lane-dense output slab
    E = wq_ref.shape[0]
    H = num_heads
    D = E // H
    mm_dtype = t_ref.dtype  # bf16 on the low-precision path, f32 otherwise

    x_t = t_ref[...]
    x_s = s_ref[...]

    # ---- projections (MXU, f32 accumulation) --------------------------------
    q = lax.dot_general(x_t, wq_ref[...], _CONTRACT_LAST,
                        preferred_element_type=jnp.float32)
    q = q + bq_ref[...].astype(jnp.float32)                       # (T, E)

    k = lax.dot_general(x_s, wkv_ref[:E, :], _CONTRACT_LAST,
                        preferred_element_type=jnp.float32)
    k = k + bkv_ref[:, :E].astype(jnp.float32)                    # (S, E)

    v = lax.dot_general(x_s, wkv_ref[E:, :], _CONTRACT_LAST,
                        preferred_element_type=jnp.float32)
    v = v + bkv_ref[:, E:].astype(jnp.float32)                    # (S, E)

    keep = m_ref[...] != 0                                        # (1, S)

    # ---- multi-head attention (heads unrolled; H is small) ------------------
    outs = []
    for h in range(H):
        sl = slice(h * D, (h + 1) * D)
        qh = (q[:, sl] * scale).astype(mm_dtype)                  # (T, D)
        kh = k[:, sl].astype(mm_dtype)                            # (S, D)
        vh = v[:, sl].astype(mm_dtype)                            # (S, D)

        scores = lax.dot_general(qh, kh, _CONTRACT_LAST,
                                 preferred_element_type=jnp.float32)  # (T, S)
        scores = jnp.where(keep, scores, -1e30)   # finite mask: no inf/NaN path

        row_max = jnp.max(scores, axis=-1, keepdims=True)
        p = jnp.exp(scores - row_max)                             # f32
        denom = jnp.sum(p, axis=-1, keepdims=True)                # (T, 1)

        oh = jnp.dot(p.astype(mm_dtype), vh,
                     preferred_element_type=jnp.float32)          # (T, D)
        # Normalize after PV: (T,1) reciprocal + TxD mults instead of TxS divs.
        inv = pl.reciprocal(jnp.maximum(denom, 1e-30), approx=False)
        outs.append(oh * inv)

    o_ref[...] = jnp.concatenate(outs, axis=-1).astype(o_ref.dtype)


def fused_sdpa(target, source, wq, bq, wkv, bkv, mask_i32, num_heads,
               out_dtype):
    # target: (N, T, E), source: (N, S, E), mask_i32: (N, 1, S)
    N, T, E = target.shape
    S = source.shape[1]
    D = E // num_heads
    scale = 1.0 / float(D ** 0.5)

    kern = functools.partial(_fused_sdpa_kernel, num_heads=num_heads,
                             scale=scale)
    return pl.pallas_call(
        kern,
        out_shape=jax.ShapeDtypeStruct((N, T, E), out_dtype),
        grid_spec=pltpu.PrefetchScalarGridSpec(
            num_scalar_prefetch=0,
            grid=(N,),
            in_specs=[
                pl.BlockSpec((None, T, E), lambda n: (n, 0, 0)),   # target
                pl.BlockSpec((None, S, E), lambda n: (n, 0, 0)),   # source
                pl.BlockSpec((E, E), lambda n: (0, 0)),            # wq (VMEM-resident)
                pl.BlockSpec((1, E), lambda n: (0, 0)),            # bq
                pl.BlockSpec((2 * E, E), lambda n: (0, 0)),        # wkv
                pl.BlockSpec((1, 2 * E), lambda n: (0, 0)),        # bkv
                pl.BlockSpec((None, 1, S), lambda n: (n, 0, 0)),   # mask (tiny)
            ],
            out_specs=pl.BlockSpec((None, T, E), lambda n: (n, 0, 0)),
        ),
        compiler_params=pltpu.CompilerParams(
            dimension_semantics=("parallel",)),
    )(target, source, wq, bq, wkv, bkv, mask_i32)


# ---------------------------------------------------------------------------
# Module wrapper (parameters initialized deterministically in-script)
# ---------------------------------------------------------------------------
class ScaledDotProductAttentionPallas:
    def __init__(self, embed_dim, num_heads, dropout_p, key):
        self.embed_dim = embed_dim
        self.num_heads = num_heads
        # TODO(synk): dropout_p > 0 not applied (inference / eval semantics).
        self.dropout_p = dropout_p
        k1, k2, k3, k4 = jax.random.split(key, 4)
        bound = 1.0 / (embed_dim ** 0.5)
        self.wq = jax.random.uniform(k1, (embed_dim, embed_dim),
                                     jnp.float32, -bound, bound)
        self.bq = jax.random.uniform(k2, (embed_dim,), jnp.float32, -bound, bound)
        self.wkv = jax.random.uniform(k3, (2 * embed_dim, embed_dim),
                                      jnp.float32, -bound, bound)
        self.bkv = jax.random.uniform(k4, (2 * embed_dim,),
                                      jnp.float32, -bound, bound)

    def __call__(self, target, source, source_data_mask,
                 compute_dtype=jnp.float32):
        N, T, E = target.shape
        S = source.shape[1]
        out_dtype = target.dtype

        if source_data_mask is None:
            mask = jnp.ones((N, 1, S), jnp.int32)
        else:
            mask = source_data_mask.astype(jnp.int32).reshape(N, 1, S)

        cd = compute_dtype
        return fused_sdpa(
            target.astype(cd), source.astype(cd),
            self.wq.astype(cd), self.bq.reshape(1, E).astype(cd),
            self.wkv.astype(cd), self.bkv.reshape(1, 2 * E).astype(cd),
            mask, self.num_heads, out_dtype)


# ---------------------------------------------------------------------------
# Pure-JAX reference (for correctness check)
# ---------------------------------------------------------------------------
def reference_forward(mod, target, source, source_data_mask):
    N, T, E = target.shape
    S = source.shape[1]
    H, D = mod.num_heads, E // mod.num_heads
    q = target @ mod.wq.T + mod.bq
    kv = source @ mod.wkv.T + mod.bkv
    k, v = kv[..., :E], kv[..., E:]
    qh = q.reshape(N, T, H, D).transpose(0, 2, 1, 3)
    kh = k.reshape(N, S, H, D).transpose(0, 2, 1, 3)
    vh = v.reshape(N, S, H, D).transpose(0, 2, 1, 3)
    s = jnp.einsum("nhtd,nhsd->nhts", qh, kh) / (D ** 0.5)
    if source_data_mask is not None:
        m = source_data_mask[:, None, None, :]
        s = jnp.where(m, s, -jnp.inf)
    p = jax.nn.softmax(s, axis=-1)
    o = jnp.einsum("nhts,nhsd->nhtd", p, vh)
    return o.transpose(0, 2, 1, 3).reshape(N, T, E)


if __name__ == "__main__":
    # Small shapes consistent with the module's forward.
    N, T, S, E, H = 2, 8, 8, 32, 4

    root = jax.random.PRNGKey(0)
    k_params, k_tgt, k_src = jax.random.split(root, 3)

    module = ScaledDotProductAttentionPallas(
        embed_dim=E, num_heads=H, dropout_p=0.0, key=k_params)

    target = jax.random.normal(k_tgt, (N, T, E), jnp.float32)
    source = jax.random.normal(k_src, (N, S, E), jnp.float32)
    # boolean source padding mask: batch 0 has 6 valid positions, batch 1 has 8.
    lens = jnp.array([6, 8], dtype=jnp.int32)
    source_data_mask = jnp.arange(S)[None, :] < lens[:, None]   # (N, S) bool

    ref = reference_forward(module, target, source, source_data_mask)

    # f32 compute path: tight check against the pure-JAX reference.
    out = module(target, source, source_data_mask)
    out = jax.block_until_ready(out)
    assert out.shape == (N, T, E)
    assert jnp.allclose(out, ref, atol=1e-5, rtol=1e-5)

    # bf16 matmul-operand path (MXU-native on v6e/v7x): loose sanity check.
    out_bf16 = module(target, source, source_data_mask,
                      compute_dtype=jnp.bfloat16)
    out_bf16 = jax.block_until_ready(out_bf16)
    assert out_bf16.shape == (N, T, E)
    assert bool(jnp.all(jnp.isfinite(out_bf16)))
    assert float(jnp.max(jnp.abs(out_bf16 - ref))) < 0.3

    print("KERNEL_OK")
</pallas_src>

<mosaic_0001>
module attributes {stable_mosaic.version = 11 : i64} {
  func.func @_fused_sdpa_kernel(%arg0: i32, %arg1: memref<1x8x32xf32, #tpu.memory_space<vmem>>, %arg2: memref<1x8x32xf32, #tpu.memory_space<vmem>>, %arg3: memref<32x32xf32, #tpu.memory_space<vmem>>, %arg4: memref<1x32xf32, #tpu.memory_space<vmem>>, %arg5: memref<64x32xf32, #tpu.memory_space<vmem>>, %arg6: memref<1x64xf32, #tpu.memory_space<vmem>>, %arg7: memref<1x1x8xi32, #tpu.memory_space<vmem>>, %arg8: memref<1x8x32xf32, #tpu.memory_space<vmem>>) attributes {dimension_semantics = [#tpu.dimension_semantics<parallel>], iteration_bounds = array<i64: 2>, scalar_prefetch = 0 : i64, scratch_operands = 0 : i64, tpu.core_type = #tpu.core_type<tc>, window_params = [{transform_indices = @transform_0, window_bounds = array<i64: 1, 8, 32>}, {transform_indices = @transform_1, window_bounds = array<i64: 1, 8, 32>}, {pipeline_mode = #tpu.pipeline_mode<synchronous>, transform_indices = @transform_2, window_bounds = array<i64: 32, 32>}, {pipeline_mode = #tpu.pipeline_mode<synchronous>, transform_indices = @transform_3, window_bounds = array<i64: 1, 32>}, {pipeline_mode = #tpu.pipeline_mode<synchronous>, transform_indices = @transform_4, window_bounds = array<i64: 64, 32>}, {pipeline_mode = #tpu.pipeline_mode<synchronous>, transform_indices = @transform_5, window_bounds = array<i64: 1, 64>}, {transform_indices = @transform_6, window_bounds = array<i64: 1, 1, 8>}, {transform_indices = @transform_7, window_bounds = array<i64: 1, 8, 32>}]} {
    %c0 = arith.constant 0 : index
    %c0_0 = arith.constant 0 : index
    %c0_1 = arith.constant 0 : index
    %0 = vector.load %arg1[%c0, %c0_0, %c0_1] : memref<1x8x32xf32, #tpu.memory_space<vmem>>, vector<1x8x32xf32>
    %1 = vector.shape_cast %0 : vector<1x8x32xf32> to vector<8x32xf32>
    %c0_2 = arith.constant 0 : index
    %c0_3 = arith.constant 0 : index
    %c0_4 = arith.constant 0 : index
    %2 = vector.load %arg2[%c0_2, %c0_3, %c0_4] : memref<1x8x32xf32, #tpu.memory_space<vmem>>, vector<1x8x32xf32>
    %3 = vector.shape_cast %2 : vector<1x8x32xf32> to vector<8x32xf32>
    %c0_5 = arith.constant 0 : index
    %c0_6 = arith.constant 0 : index
    %4 = vector.load %arg3[%c0_5, %c0_6] : memref<32x32xf32, #tpu.memory_space<vmem>>, vector<32x32xf32>
    %cst = arith.constant dense<0.000000e+00> : vector<8x32xf32>
    %5 = tpu.matmul %1, %4, %cst {dimension_numbers = #tpu.dot_dimension_numbers<[1], [1], [0], [0], [0, 0, 1, 0], [], []>} : vector<8x32xf32>, vector<32x32xf32>, vector<8x32xf32> -> vector<8x32xf32>
    %c0_7 = arith.constant 0 : index
    %c0_8 = arith.constant 0 : index
    %6 = vector.load %arg4[%c0_7, %c0_8] : memref<1x32xf32, #tpu.memory_space<vmem>>, vector<1x32xf32>
    %7 = vector.broadcast %6 : vector<1x32xf32> to vector<8x32xf32>
    %8 = arith.addf %5, %7 : vector<8x32xf32>
    %c0_9 = arith.constant 0 : index
    %c0_10 = arith.constant 0 : index
    %9 = vector.load %arg5[%c0_9, %c0_10] : memref<64x32xf32, #tpu.memory_space<vmem>>, vector<32x32xf32>
    %cst_11 = arith.constant dense<0.000000e+00> : vector<8x32xf32>
    %10 = tpu.matmul %3, %9, %cst_11 {dimension_numbers = #tpu.dot_dimension_numbers<[1], [1], [0], [0], [0, 0, 1, 0], [], []>} : vector<8x32xf32>, vector<32x32xf32>, vector<8x32xf32> -> vector<8x32xf32>
    %c0_12 = arith.constant 0 : index
    %c0_13 = arith.constant 0 : index
    %11 = vector.load %arg6[%c0_12, %c0_13] : memref<1x64xf32, #tpu.memory_space<vmem>>, vector<1x32xf32>
    %12 = vector.broadcast %11 : vector<1x32xf32> to vector<8x32xf32>
    %13 = arith.addf %10, %12 : vector<8x32xf32>
    %c32 = arith.constant 32 : index
    %c0_14 = arith.constant 0 : index
    %14 = vector.load %arg5[%c32, %c0_14] : memref<64x32xf32, #tpu.memory_space<vmem>>, vector<32x32xf32>
    %cst_15 = arith.constant dense<0.000000e+00> : vector<8x32xf32>
    %15 = tpu.matmul %3, %14, %cst_15 {dimension_numbers = #tpu.dot_dimension_numbers<[1], [1], [0], [0], [0, 0, 1, 0], [], []>} : vector<8x32xf32>, vector<32x32xf32>, vector<8x32xf32> -> vector<8x32xf32>
    %c0_16 = arith.constant 0 : index
    %c32_17 = arith.constant 32 : index
    %16 = vector.load %arg6[%c0_16, %c32_17] : memref<1x64xf32, #tpu.memory_space<vmem>>, vector<1x32xf32>
    %17 = vector.broadcast %16 : vector<1x32xf32> to vector<8x32xf32>
    %18 = arith.addf %15, %17 : vector<8x32xf32>
    %c0_18 = arith.constant 0 : index
    %c0_19 = arith.constant 0 : index
    %c0_20 = arith.constant 0 : index
    %19 = vector.load %arg7[%c0_18, %c0_19, %c0_20] : memref<1x1x8xi32, #tpu.memory_space<vmem>>, vector<1x1x8xi32>
    %20 = vector.shape_cast %19 : vector<1x1x8xi32> to vector<1x8xi32>
    %c0_i32 = arith.constant 0 : i32
    %21 = vector.broadcast %c0_i32 : i32 to vector<1x8xi32>
    %22 = arith.cmpi ne, %20, %21 : vector<1x8xi32>
    %23 = vector.extract_strided_slice %8 {offsets = [0, 0], sizes = [8, 8], strides = [1, 1]} : vector<8x32xf32> to vector<8x8xf32>
    %cst_21 = arith.constant 0.353553385 : f32
    %24 = vector.broadcast %cst_21 : f32 to vector<8x8xf32>
    %25 = arith.mulf %23, %24 : vector<8x8xf32>
    %26 = vector.extract_strided_slice %13 {offsets = [0, 0], sizes = [8, 8], strides = [1, 1]} : vector<8x32xf32> to vector<8x8xf32>
    %27 = vector.extract_strided_slice %18 {offsets = [0, 0], sizes = [8, 8], strides = [1, 1]} : vector<8x32xf32> to vector<8x8xf32>
    %cst_22 = arith.constant dense<0.000000e+00> : vector<8x8xf32>
    %28 = tpu.matmul %25, %26, %cst_22 {dimension_numbers = #tpu.dot_dimension_numbers<[1], [1], [0], [0], [0, 0, 1, 0], [], []>} : vector<8x8xf32>, vector<8x8xf32>, vector<8x8xf32> -> vector<8x8xf32>
    %cst_23 = arith.constant -1.000000e+30 : f32
    %29 = vector.shape_cast %22 : vector<1x8xi1> to vector<1x8xi1>
    %30 = vector.broadcast %29 : vector<1x8xi1> to vector<8x8xi1>
    %31 = vector.broadcast %cst_23 : f32 to vector<8x8xf32>
    %32 = arith.select %30, %28, %31 : vector<8x8xi1>, vector<8x8xf32>
    %cst_24 = arith.constant dense<0xFF800000> : vector<8xf32>
    %33 = vector.multi_reduction <maximumf>, %32, %cst_24 [1] : vector<8x8xf32> to vector<8xf32>
    %34 = vector.shape_cast %33 : vector<8xf32> to vector<8x1xf32>
    %35 = vector.broadcast %34 : vector<8x1xf32> to vector<8x8xf32>
    %36 = arith.subf %32, %35 : vector<8x8xf32>
    %37 = math.exp %36 : vector<8x8xf32>
    %cst_25 = arith.constant dense<0.000000e+00> : vector<8xf32>
    %38 = vector.multi_reduction <add>, %37, %cst_25 [1] : vector<8x8xf32> to vector<8xf32>
    %39 = vector.shape_cast %38 : vector<8xf32> to vector<8x1xf32>
    %cst_26 = arith.constant dense<0.000000e+00> : vector<8x8xf32>
    %40 = tpu.matmul %37, %27, %cst_26 {dimension_numbers = #tpu.dot_dimension_numbers<[1], [0], [0], [1], [0, 0, 1, 1], [], []>} : vector<8x8xf32>, vector<8x8xf32>, vector<8x8xf32> -> vector<8x8xf32>
    %cst_27 = arith.constant 1.000000e-30 : f32
    %41 = vector.broadcast %cst_27 : f32 to vector<8x1xf32>
    %42 = arith.maximumf %39, %41 : vector<8x1xf32>
    %43 = tpu.reciprocal %42 : vector<8x1xf32> -> vector<8x1xf32>
    %44 = vector.broadcast %43 : vector<8x1xf32> to vector<8x8xf32>
    %45 = arith.mulf %40, %44 : vector<8x8xf32>
    %46 = vector.extract_strided_slice %8 {offsets = [0, 8], sizes = [8, 8], strides = [1, 1]} : vector<8x32xf32> to vector<8x8xf32>
    %cst_28 = arith.constant 0.353553385 : f32
    %47 = vector.broadcast %cst_28 : f32 to vector<8x8xf32>
    %48 = arith.mulf %46, %47 : vector<8x8xf32>
    %49 = vector.extract_strided_slice %13 {offsets = [0, 8], sizes = [8, 8], strides = [1, 1]} : vector<8x32xf32> to vector<8x8xf32>
    %50 = vector.extract_strided_slice %18 {offsets = [0, 8], sizes = [8, 8], strides = [1, 1]} : vector<8x32xf32> to vector<8x8xf32>
    %cst_29 = arith.constant dense<0.000000e+00> : vector<8x8xf32>
    %51 = tpu.matmul %48, %49, %cst_29 {dimension_numbers = #tpu.dot_dimension_numbers<[1], [1], [0], [0], [0, 0, 1, 0], [], []>} : vector<8x8xf32>, vector<8x8xf32>, vector<8x8xf32> -> vector<8x8xf32>
    %cst_30 = arith.constant -1.000000e+30 : f32
    %52 = vector.shape_cast %22 : vector<1x8xi1> to vector<1x8xi1>
    %53 = vector.broadcast %52 : vector<1x8xi1> to vector<8x8xi1>
    %54 = vector.broadcast %cst_30 : f32 to vector<8x8xf32>
    %55 = arith.select %53, %51, %54 : vector<8x8xi1>, vector<8x8xf32>
    %cst_31 = arith.constant dense<0xFF800000> : vector<8xf32>
    %56 = vector.multi_reduction <maximumf>, %55, %cst_31 [1] : vector<8x8xf32> to vector<8xf32>
    %57 = vector.shape_cast %56 : vector<8xf32> to vector<8x1xf32>
    %58 = vector.broadcast %57 : vector<8x1xf32> to vector<8x8xf32>
    %59 = arith.subf %55, %58 : vector<8x8xf32>
    %60 = math.exp %59 : vector<8x8xf32>
    %cst_32 = arith.constant dense<0.000000e+00> : vector<8xf32>
    %61 = vector.multi_reduction <add>, %60, %cst_32 [1] : vector<8x8xf32> to vector<8xf32>
    %62 = vector.shape_cast %61 : vector<8xf32> to vector<8x1xf32>
    %cst_33 = arith.constant dense<0.000000e+00> : vector<8x8xf32>
    %63 = tpu.matmul %60, %50, %cst_33 {dimension_numbers = #tpu.dot_dimension_numbers<[1], [0], [0], [1], [0, 0, 1, 1], [], []>} : vector<8x8xf32>, vector<8x8xf32>, vector<8x8xf32> -> vector<8x8xf32>
    %cst_34 = arith.constant 1.000000e-30 : f32
    %64 = vector.broadcast %cst_34 : f32 to vector<8x1xf32>
    %65 = arith.maximumf %62, %64 : vector<8x1xf32>
    %66 = tpu.reciprocal %65 : vector<8x1xf32> -> vector<8x1xf32>
    %67 = vector.broadcast %66 : vector<8x1xf32> to vector<8x8xf32>
    %68 = arith.mulf %63, %67 : vector<8x8xf32>
    %69 = vector.extract_strided_slice %8 {offsets = [0, 16], sizes = [8, 8], strides = [1, 1]} : vector<8x32xf32> to vector<8x8xf32>
    %cst_35 = arith.constant 0.353553385 : f32
    %70 = vector.broadcast %cst_35 : f32 to vector<8x8xf32>
    %71 = arith.mulf %69, %70 : vector<8x8xf32>
    %72 = vector.extract_strided_slice %13 {offsets = [0, 16], sizes = [8, 8], strides = [1, 1]} : vector<8x32xf32> to vector<8x8xf32>
    %73 = vector.extract_strided_slice %18 {offsets = [0, 16], sizes = [8, 8], strides = [1, 1]} : vector<8x32xf32> to vector<8x8xf32>
    %cst_36 = arith.constant dense<0.000000e+00> : vector<8x8xf32>
    %74 = tpu.matmul %71, %72, %cst_36 {dimension_numbers = #tpu.dot_dimension_numbers<[1], [1], [0], [0], [0, 0, 1, 0], [], []>} : vector<8x8xf32>, vector<8x8xf32>, vector<8x8xf32> -> vector<8x8xf32>
    %cst_37 = arith.constant -1.000000e+30 : f32
    %75 = vector.shape_cast %22 : vector<1x8xi1> to vector<1x8xi1>
    %76 = vector.broadcast %75 : vector<1x8xi1> to vector<8x8xi1>
    %77 = vector.broadcast %cst_37 : f32 to vector<8x8xf32>
    %78 = arith.select %76, %74, %77 : vector<8x8xi1>, vector<8x8xf32>
    %cst_38 = arith.constant dense<0xFF800000> : vector<8xf32>
    %79 = vector.multi_reduction <maximumf>, %78, %cst_38 [1] : vector<8x8xf32> to vector<8xf32>
    %80 = vector.shape_cast %79 : vector<8xf32> to vector<8x1xf32>
    %81 = vector.broadcast %80 : vector<8x1xf32> to vector<8x8xf32>
    %82 = arith.subf %78, %81 : vector<8x8xf32>
    %83 = math.exp %82 : vector<8x8xf32>
    %cst_39 = arith.constant dense<0.000000e+00> : vector<8xf32>
    %84 = vector.multi_reduction <add>, %83, %cst_39 [1] : vector<8x8xf32> to vector<8xf32>
    %85 = vector.shape_cast %84 : vector<8xf32> to vector<8x1xf32>
    %cst_40 = arith.constant dense<0.000000e+00> : vector<8x8xf32>
    %86 = tpu.matmul %83, %73, %cst_40 {dimension_numbers = #tpu.dot_dimension_numbers<[1], [0], [0], [1], [0, 0, 1, 1], [], []>} : vector<8x8xf32>, vector<8x8xf32>, vector<8x8xf32> -> vector<8x8xf32>
    %cst_41 = arith.constant 1.000000e-30 : f32
    %87 = vector.broadcast %cst_41 : f32 to vector<8x1xf32>
    %88 = arith.maximumf %85, %87 : vector<8x1xf32>
    %89 = tpu.reciprocal %88 : vector<8x1xf32> -> vector<8x1xf32>
    %90 = vector.broadcast %89 : vector<8x1xf32> to vector<8x8xf32>
    %91 = arith.mulf %86, %90 : vector<8x8xf32>
    %92 = vector.extract_strided_slice %8 {offsets = [0, 24], sizes = [8, 8], strides = [1, 1]} : vector<8x32xf32> to vector<8x8xf32>
    %cst_42 = arith.constant 0.353553385 : f32
    %93 = vector.broadcast %cst_42 : f32 to vector<8x8xf32>
    %94 = arith.mulf %92, %93 : vector<8x8xf32>
    %95 = vector.extract_strided_slice %13 {offsets = [0, 24], sizes = [8, 8], strides = [1, 1]} : vector<8x32xf32> to vector<8x8xf32>
    %96 = vector.extract_strided_slice %18 {offsets = [0, 24], sizes = [8, 8], strides = [1, 1]} : vector<8x32xf32> to vector<8x8xf32>
    %cst_43 = arith.constant dense<0.000000e+00> : vector<8x8xf32>
    %97 = tpu.matmul %94, %95, %cst_43 {dimension_numbers = #tpu.dot_dimension_numbers<[1], [1], [0], [0], [0, 0, 1, 0], [], []>} : vector<8x8xf32>, vector<8x8xf32>, vector<8x8xf32> -> vector<8x8xf32>
    %cst_44 = arith.constant -1.000000e+30 : f32
    %98 = vector.shape_cast %22 : vector<1x8xi1> to vector<1x8xi1>
    %99 = vector.broadcast %98 : vector<1x8xi1> to vector<8x8xi1>
    %100 = vector.broadcast %cst_44 : f32 to vector<8x8xf32>
    %101 = arith.select %99, %97, %100 : vector<8x8xi1>, vector<8x8xf32>
    %cst_45 = arith.constant dense<0xFF800000> : vector<8xf32>
    %102 = vector.multi_reduction <maximumf>, %101, %cst_45 [1] : vector<8x8xf32> to vector<8xf32>
    %103 = vector.shape_cast %102 : vector<8xf32> to vector<8x1xf32>
    %104 = vector.broadcast %103 : vector<8x1xf32> to vector<8x8xf32>
    %105 = arith.subf %101, %104 : vector<8x8xf32>
    %106 = math.exp %105 : vector<8x8xf32>
    %cst_46 = arith.constant dense<0.000000e+00> : vector<8xf32>
    %107 = vector.multi_reduction <add>, %106, %cst_46 [1] : vector<8x8xf32> to vector<8xf32>
    %108 = vector.shape_cast %107 : vector<8xf32> to vector<8x1xf32>
    %cst_47 = arith.constant dense<0.000000e+00> : vector<8x8xf32>
    %109 = tpu.matmul %106, %96, %cst_47 {dimension_numbers = #tpu.dot_dimension_numbers<[1], [0], [0], [1], [0, 0, 1, 1], [], []>} : vector<8x8xf32>, vector<8x8xf32>, vector<8x8xf32> -> vector<8x8xf32>
    %cst_48 = arith.constant 1.000000e-30 : f32
    %110 = vector.broadcast %cst_48 : f32 to vector<8x1xf32>
    %111 = arith.maximumf %108, %110 : vector<8x1xf32>
    %112 = tpu.reciprocal %111 : vector<8x1xf32> -> vector<8x1xf32>
    %113 = vector.broadcast %112 : vector<8x1xf32> to vector<8x8xf32>
    %114 = arith.mulf %109, %113 : vector<8x8xf32>
    %115 = tpu.concatenate %45, %68, %91, %114 in 1 : vector<8x8xf32>, vector<8x8xf32>, vector<8x8xf32>, vector<8x8xf32> -> vector<8x32xf32>
    %c0_49 = arith.constant 0 : index
    %c0_50 = arith.constant 0 : index
    %c0_51 = arith.constant 0 : index
    %116 = vector.load %arg8[%c0_49, %c0_50, %c0_51] : memref<1x8x32xf32, #tpu.memory_space<vmem>>, vector<1x8x32xf32>
    %117 = vector.shape_cast %116 : vector<1x8x32xf32> to vector<8x32xf32>
    %118 = vector.shape_cast %115 : vector<8x32xf32> to vector<1x8x32xf32>
    tpu.vector_store %arg8[%c0_49, %c0_50, %c0_51], %118 {strides = array<i32>} : memref<1x8x32xf32, #tpu.memory_space<vmem>>, vector<1x8x32xf32>,
    return
  }
  func.func @transform_0(%arg0: i32) -> (i32, i32, i32) {
    %c0_i32 = arith.constant 0 : i32
    %c0_i32_0 = arith.constant 0 : i32
    %c0_i32_1 = arith.constant 0 : i32
    return %arg0, %c0_i32, %c0_i32_0 : i32, i32, i32
  }
  func.func @transform_1(%arg0: i32) -> (i32, i32, i32) {
    %c0_i32 = arith.constant 0 : i32
    %c0_i32_0 = arith.constant 0 : i32
    %c0_i32_1 = arith.constant 0 : i32
    return %arg0, %c0_i32, %c0_i32_0 : i32, i32, i32
  }
  func.func @transform_2(%arg0: i32) -> (i32, i32) {
    %c0_i32 = arith.constant 0 : i32
    %c0_i32_0 = arith.constant 0 : i32
    %c0_i32_1 = arith.constant 0 : i32
    return %c0_i32, %c0_i32_0 : i32, i32
  }
  func.func @transform_3(%arg0: i32) -> (i32, i32) {
    %c0_i32 = arith.constant 0 : i32
    %c0_i32_0 = arith.constant 0 : i32
    %c0_i32_1 = arith.constant 0 : i32
    return %c0_i32, %c0_i32_0 : i32, i32
  }
  func.func @transform_4(%arg0: i32) -> (i32, i32) {
    %c0_i32 = arith.constant 0 : i32
    %c0_i32_0 = arith.constant 0 : i32
    %c0_i32_1 = arith.constant 0 : i32
    return %c0_i32, %c0_i32_0 : i32, i32
  }
  func.func @transform_5(%arg0: i32) -> (i32, i32) {
    %c0_i32 = arith.constant 0 : i32
    %c0_i32_0 = arith.constant 0 : i32
    %c0_i32_1 = arith.constant 0 : i32
    return %c0_i32, %c0_i32_0 : i32, i32
  }
  func.func @transform_6(%arg0: i32) -> (i32, i32, i32) {
    %c0_i32 = arith.constant 0 : i32
    %c0_i32_0 = arith.constant 0 : i32
    %c0_i32_1 = arith.constant 0 : i32
    return %arg0, %c0_i32, %c0_i32_0 : i32, i32, i32
  }
  func.func @transform_7(%arg0: i32) -> (i32, i32, i32) {
    %c0_i32 = arith.constant 0 : i32
    %c0_i32_0 = arith.constant 0 : i32
    %c0_i32_1 = arith.constant 0 : i32
    return %arg0, %c0_i32, %c0_i32_0 : i32, i32, i32
  }
}

</mosaic_0001>

<bundles_post_ra>
// kernel: tpu_custom_call.1
= control target key start
LH: loop header
LB: loop body
LE: loop exit
PB: predicated region body
PF: predicated region fallthrough
CT: control target
= control target key end

     0   :  { %12 = vsyncpa [#allocation3], 0  ;;  %s1283_s0 = inlined_call_operand.vmem [shape: f32[2,8,32], index: 0, kind: input, shape index: {}]   ;;  %s1284_s1 = inlined_call_operand.vmem [shape: f32[2,8,32], index: 1, kind: input, shape index: {}]   ;;  %s1285_s2 = inlined_call_operand.vmem [shape: f32[32,32], index: 2, kind: input, shape index: {}]   ;;  %s1286_s3 = inlined_call_operand.vmem [shape: f32[1,32], index: 3, kind: input, shape index: {}]   ;;  %s1287_s4 = inlined_call_operand.vmem [shape: f32[64,32], index: 4, kind: input, shape index: {}]   ;;  %s1288_s5 = inlined_call_operand.vmem [shape: f32[1,64], index: 5, kind: input, shape index: {}]   ;;  %s1289_s6 = inlined_call_operand.vmem [shape: s32[2,1,8], index: 6, kind: input, shape index: {}]   ;;  %s1290_s7 = inlined_call_operand.hbm [shape: f32[2,8,32], index: 7, kind: output, shape index: {}]  }
   0x1   :  { %14 = vsyncpa [#allocation3 + $0x1], 0  ;;  %s1085_s24 = smov 0   ;;  %s1087_s25 = smov 0  }
   0x2   :  { %s1089_s26 = smov 0   ;;  %s1091_s27 = smov 0  }
   0x3 LB: > { %s1106_s28 = sadd.s32 4294967295, %s1035_s27   ;;  %s870_s29 = sadd.s32 4294967294, %s1035_s27   ;;  %s1035_s27 = sphi %s1091_s27, %s1298_s27   ;;  %s1031_s26 = sphi %s1089_s26, %s1297_s26   ;;  %s1027_s25 = sphi %s1087_s25, %s1296_s25   ;;  %s1023_s24 = sphi %s1085_s24, %s1295_s24  }
   0x4   : > { %s1110_s30 = sadd.s32 1, %s1035_s27   ;;  %s189_s8 = sadd.s32 1, %s1031_s26 }
   0x5   : > { %s186_s9 = ssub.s32 %s1035_s27, %s1110_s30  ;;  %p199_p0 = scmp.ne.s32.totalorder %s1031_s26, %s1027_s25 }
   0x6   : > { %p187_p1 = scmp.eq.s32.totalorder %s186_s9, 0  ;;  %p200_p2 = scmp.eq.s32.totalorder %s1106_s28, 1 }
   0x7   : > { %p205_p3 = scmp.ne.s32.totalorder %s1027_s25, %s1023_s24  ;;  %p206_p4 = scmp.eq.s32.totalorder %s870_s29, 1 }
   0x8   : > { %s1121_s10 = scalar_select %p187_p1, %s1031_s26, %s189_s8  }
   0x9   : > { %p1123_p5 = por %p200_p2, %p199_p0  ;;  %p1127_p6 = por %p206_p4, %p205_p3 }
   0xa   : > { %p873_p7 = scmp.ge.s32.totalorder %s1035_s27, 1  ;;  %p256_p8 = scmp.lt.s32.totalorder %s1035_s27, 3 }
   0xc   : > { %p257_p9 = pnand %p873_p7, %p256_p8 }
   0xd   : > { %p294_p10 = scmp.lt.s32.totalorder (!%p257_p9), %s1106_s28, 1  ;;  %s1038_s15 = smov (!%p257_p9), 120  }
   0xe   : > { %260 = sbr.rel (%p257_p9) target bundleno = 976 (0x3d0), region = 48  ;;  %s1039_s16 = smov (!%p257_p9), 104  }
   0xf   : > { %s291_s18 = sand.u32 (!%p257_p9), 1, %s1027_s25   ;;  %s905_s20 = sshll.u32 (!%p257_p9), %s1106_s28, 3 }
  0x10   : > { %s785_s29 = scalar_lea.hbm (!%p257_p9), %s1290_s7, %s905_s20 }
  0x11   : > { %s789_s14 = sshll.u32 (!%p257_p9), %s785_s29, 4  ;;  %s790_s14 = int_to_ptr.hbm [resolvable:$true] %s789_s14 }
  0x13   : > { %vm315_vm0 = vcmask 261120   ;;  %v354_v0 = vld [vmem:[%s1287_s4 + $0x18] sm:$0xff]  ;;  %v353_v2 = vld [vmem:[%s1287_s4 + $0x10] sm:$0xff]  ;;  %s1149_s21 = scalar_select %p294_p10, %s1106_s28, 1  ;;  %v352_v4 = vld [vmem:[%s1287_s4 + $0x8] sm:$0xff]  ;;  %vm436_vm1 = vcmask 64512  }
  0x14   : > { %v310_v1 = vld [vmem:[%s1285_s2 + $0x18] sm:$0xff]  ;;  %882 = vmatpush.xpose.msk.msra.mxu1 %vm315_vm0, %v354_v0  ;;  %v309_v3 = vld [vmem:[%s1285_s2 + $0x10] sm:$0xff]  ;;  %v308_v5 = vld [vmem:[%s1285_s2 + $0x8] sm:$0xff]  ;;  %v1040_v25 = vmov 0   ;;  %s775_s28 = scalar_lea.sflag [#allocation3], %s291_s18 }
  0x15   : > { %877 = vmatpush.xpose.msk.msra.mxu0 %vm315_vm0, %v310_v1  ;;  %s875_s9 = sshll.u32 %s1149_s21, 3  ;;  %v351_v6 = vld [vmem:[%s1287_s4] sm:$0xff]  ;;  %v397_v18 = vld [vmem:[%s1287_s4 + $0x38] sm:$0xff]  ;;  %v396_v19 = vld [vmem:[%s1287_s4 + $0x30] sm:$0xff]  ;;  %s304_s17 = scalar_lea.vmem %s1289_s6, %s1149_s21 }
  0x16   : > { %v307_v7 = vld [vmem:[%s1285_s2] sm:$0xff]  ;;  %s301_s19 = scalar_lea.vmem %s1284_s1, %s875_s9  ;;  %s297_s23 = scalar_lea.vmem %s1283_s0, %s875_s9  ;;  %887 = vmatpush.xpose.msk.msra.mxu2 %vm315_vm0, %v397_v18  ;;  %v395_v20 = vld [vmem:[%s1287_s4 + $0x28] sm:$0xff] }
  0x17   : > { %v306_v8 = vld [vmem:[%s301_s19] sm:$0xff]  ;;  %s1037_s9 = smov 112   ;;  %s1041_s21 = smov 96  }
  0x18   : > { %883 = vmatpush.xpose.msk.msra.mxu1 %vm315_vm0, %v353_v2  ;;  %v305_v9 = vld [vmem:[%s297_s23] sm:$0xff]  ;;  %s874_s19 = sshll.u32 %s291_s18, 3 }
  0x19   : > { %878 = vmatpush.xpose.msk.msra.mxu0 %vm315_vm0, %v309_v3  ;;  %v955_v10 = vld [vmem:[%s1288_s5] ss:$0 sm:$0xff]  ;;  %s293_s8 = scalar_lea.vmem [#allocation2], %s874_s19 }
  0x1a   : > { %v956_v11 = vld [vmem:[%s1286_s3] ss:$0 sm:$0xff]  ;;  %888 = vmatpush.xpose.msk.msra.mxu2 %vm315_vm0, %v396_v19  ;;  %s787_s13 = sshll.u32 %s293_s8, 4  ;;  %s788_s13 = int_to_ptr.vmem [resolvable:$true] %s787_s13 }
  0x1b   : > { %v394_v21 = vld [vmem:[%s1287_s4 + $0x20] sm:$0xff] }
  0x1c   : > { %884 = vmatpush.xpose.msk.msra.mxu1 %vm315_vm0, %v352_v4  ;;  %v433_v23 = vld [vmem:[%s304_s17] sm:$0x1]  ;;  %s987_s17 = sshra.s32 %s790_s14, 4  ;;  %s988_s17 = int_to_ptr.hbm [resolvable:$true] %s987_s17 }
  0x1d   : > { %879 = vmatpush.xpose.msk.msra.mxu0 %vm315_vm0, %v308_v5  ;;  %vm434_vm2 = vcmp.ne.s32.totalorder %v433_v23, 0  ;;  %p994_p0 = scmp.lt.s32.totalorder %s988_s17, %s1290_s7 }
  0x1e   : > { %889 = vmatpush.xpose.msk.msra.mxu2 %vm315_vm0, %v395_v20  ;;  %v463_v26 = vsel %vm434_vm2, 1, %v1040_v25 }
  0x1f   : > { %v464_v27 = vperm.slane %v463_v26, 0 }
  0x20   : > { %885 = vmatpush.xpose.msk.msra.mxu1 %vm315_vm0, %v351_v6 }
  0x21   : > { %880 = vmatpush.xpose.msk.msra.mxu0 %vm315_vm0, %v307_v7  ;;  %vm1215_vm3 = vcmp.eq.s32.totalorder %v464_v27, 1 }
  0x22   : > { %890 = vmatpush.xpose.msk.msra.mxu2 %vm315_vm0, %v394_v21 }
  0x23   : > { %886 = vmatmul.msk.f32.vlgmr.msra.gmra.mxu1 %vm315_vm0, %v306_v8 }
  0x24   : > { %881 = vmatmul.msk.f32.vlgmr.msra.gmra.mxu0 %vm315_vm0, %v305_v9 }
  0x25   : > { %891 = vmatmul.msk.f32.vlgmr.msra.gmra.mxu2 %vm315_vm0, %v306_v8 }
  0xa0   : > { %v391_v12 = vpop.f32.mrf.mxu1 }
  0xa1   : > { %v348_v13 = vpop.f32.mrf.mxu0  ;;  %v392_v14 = vadd.f32 %v955_v10, %v391_v12 }
  0xa2   : > { %v349_v15 = vadd.f32 %v956_v11, %v348_v13 }
  0xa3   : > { %598 = vrot.lane.b32.xlu2 %v392_v14, %s1037_s9  ;;  %517 = vrot.lane.b32.xlu1 %v392_v14, %s1038_s15 }
  0xa4   : > { %v435_v16 = vmul.f32 0.35355338, %v349_v15  ;;  %892 = vmatpush.xpose.msk.msra.mxu3 %vm436_vm1, %v392_v14 }
  0xa7   : > { %893 = vmatmul.msk.f32.vlgmr.msra.gmra.mxu3 %vm436_vm1, %v435_v16 }
  0xa8   : > { %v430_v39 = vpop.f32.mrf.mxu2 }
  0xab   : > { %678 = vrot.lane.b32.xlu2 %v392_v14, %s1039_s16  ;;  %515 = vrot.lane.b32.xlu1 %v435_v16, %s1038_s15 }
  0xb3   : > { %676 = vrot.lane.b32.xlu2 %v435_v16, %s1039_s16  ;;  %596 = vrot.lane.b32.xlu1 %v435_v16, %s1037_s9 }
  0xfd   : > { %v599_v17 = vpop.permute.xlu2 %598 }
  0xfe   : > { %898 = vmatpush.xpose.msk.msrb.mxu1 %vm436_vm1, %v599_v17 }
 0x105   : > { %v679_v43 = vpop.permute.xlu2 %678 }
 0x10d   : > { %v677_v44 = vpop.permute.xlu2 %676 }
 0x115   : > { %v518_v22 = vpop.permute.xlu1 %517 }
 0x11d   : > { %v516_v24 = vpop.permute.xlu1 %515 }
 0x125   : > { %v597_v28 = vpop.permute.xlu1 %596 }
 0x126   : > { %899 = vmatmul.msk.f32.vlgmr.msrb.gmra.mxu1 %vm436_vm1, %v597_v28 }
 0x12a   : > { %v460_v30 = vpop.f32.mrf.mxu3 }
 0x12b   : > { %v466_v31 = vsel %vm1215_vm3, %v460_v30, -1e+30 }
 0x12c   : > { %v467_v32 = vsel %vm436_vm1, %v466_v31, -inf }
 0x12d   : > { %468 = vmax.xlane.f32.xlu0 %v467_v32 }
 0x141   : > { %398 = vrot.lane.b32.xlu0 %v955_v10, %s1041_s21  ;;  %s989_s21 = scalar_lea.hbm %s988_s17, 8 }
 0x142   : > { %p990_p11 = scmp.ne.s32.totalorder %s988_s17, %s989_s21 }
 0x144   : > { %p991_p12 = pnand %p990_p11, %p1123_p5 }
 0x146   : > { %p992_p13 = pneg %p991_p12 }
 0x1a0   : > { %v469_v35 = vpop.xlane.xlu0 %468 }
 0x1a1   : > { %v470_v37 = vsub.f32 %v466_v31, %v469_v35 }
 0x1a3   : > { %v621_v33 = vpop.f32.mrf.mxu1  ;;  %v471_v38 = vmul.f32 1.442695, %v470_v37 }
 0x1a4   : > { %v624_v34 = vsel %vm1215_vm3, %v621_v33, -1e+30 }
 0x1a5   : > { %v625_v36 = vsel %vm436_vm1, %v624_v34, -inf  ;;  %957 = vpow2.f32 %v471_v38 }
 0x1a6   : > { %626 = vmax.xlane.f32.xlu2 %v625_v36 }
 0x1ab   : > { %v958_v42 = vpop.eup %957 }
 0x1ac   : > { %v473_v4 = vsel %vm436_vm1, %v958_v42, 0.0 }
 0x1b3   : > { %v399_v40 = vpop.permute.xlu0 %398 }
 0x1b4   : > { %v431_v41 = vadd.f32 %v430_v39, %v399_v40 }
 0x1b6   : > { %494 = vmatpush.msrb.mxu3 %v431_v41 }
 0x1b7   : > { %894 = vmatmul.msk.f32.vlgmr.msrb.gmra.mxu3 %vm436_vm1, %v958_v42 }
 0x1b8   : > { %895 = vmatpush.xpose.msk.msra.mxu3 %vm436_vm1, %v518_v22 }
 0x1bc   : > { %901 = vmatpush.xpose.msk.msrb.mxu3 %vm436_vm1, %v679_v43 }
 0x1be   : > { %554 = vrot.lane.b32.xlu2 %v431_v41, %s1038_s15  ;;  %s1043_s15 = smov 24  }
 0x1bf   : > { %896 = vmatmul.msk.f32.vlgmr.msra.gmra.mxu3 %vm436_vm1, %v516_v24 }
 0x1c7   : > { %902 = vmatmul.msk.f32.vlgmr.msrb.gmra.mxu3 %vm436_vm1, %v677_v44 }
 0x219   : > { %v627_v45 = vpop.xlane.xlu2 %626 }
 0x21a   : > { %v628_v54 = vsub.f32 %v624_v34, %v627_v45 }
 0x21c   : > { %v629_v55 = vmul.f32 1.442695, %v628_v54 }
 0x21e   : > { %959 = vpow2.f32 %v629_v55 }
 0x221   : > { %v555_v46 = vpop.permute.xlu2 %554 }
 0x222   : > { %575 = vmatpush.msrb.mxu0 %v555_v46 }
 0x224   : > { %v960_v56 = vpop.eup %959 }
 0x225   : > { %v631_v57 = vsel %vm436_vm1, %v960_v56, 0.0 }
 0x23a   : > { %v1231_v47 = vpop.f32.mrf.mxu3 }
 0x242   : > { %v540_v48 = vpop.f32.mrf.mxu3 }
 0x243   : > { %v543_v49 = vsel %vm1215_vm3, %v540_v48, -1e+30 }
 0x244   : > { %v544_v50 = vsel %vm436_vm1, %v543_v49, -inf }
 0x245   : > { %545 = vmax.xlane.f32.xlu1 %v544_v50 }
 0x24a   : > { %v701_v51 = vpop.f32.mrf.mxu3 }
 0x24b   : > { %v704_v52 = vsel %vm1215_vm3, %v701_v51, -1e+30 }
 0x24c   : > { %v705_v53 = vsel %vm436_vm1, %v704_v52, -inf }
 0x24d   : > { %706 = vmax.xlane.f32.xlu0 %v705_v53 }
 0x25e   : > { %634 = vrot.lane.b32.xlu1 %v431_v41, %s1037_s9  ;;  %s1042_s9 = smov 8  }
 0x261   : > { %714 = vrot.lane.b32.xlu0 %v431_v41, %s1039_s16  ;;  %s1044_s16 = smov 16  }
 0x28b   : > { %632 = vadd.xlane.f32.xlu0 %v631_v57 }
 0x2b8   : > { %v546_v58 = vpop.xlane.xlu1 %545 }
 0x2b9   : > { %v547_v59 = vsub.f32 %v543_v49, %v546_v58 }
 0x2bb   : > { %v548_v60 = vmul.f32 1.442695, %v547_v59 }
 0x2bd   : > { %961 = vpow2.f32 %v548_v60 }
 0x2c0   : > { %v707_v61 = vpop.xlane.xlu0 %706 }
 0x2c1   : > { %v708_v62 = vsub.f32 %v704_v52, %v707_v61 }
 0x2c3   : > { %v962_v63 = vpop.eup %961  ;;  %v709_v0 = vmul.f32 1.442695, %v708_v62 }
 0x2c4   : > { %897 = vmatmul.msk.f32.vlgmr.msrb.gmra.mxu0 %vm436_vm1, %v962_v63  ;;  %v550_v1 = vsel %vm436_vm1, %v962_v63, 0.0 }
 0x2c5   : > { %963 = vpow2.f32 %v709_v0  ;;  %551 = vadd.xlane.f32.xlu2 %v550_v1 }
 0x2cb   : > { %v964_v2 = vpop.eup %963 }
 0x2cc   : > { %v711_v3 = vsel %vm436_vm1, %v964_v2, 0.0 }
 0x2cd   : > { %712 = vadd.xlane.f32.xlu1 %v711_v3  ;;  %474 = vadd.xlane.f32.xlu2 %v473_v4 }
 0x2d0   : > { %v635_v5 = vpop.permute.xlu1 %634 }
 0x2d1   : > { %655 = vmatpush.msrb.mxu2 %v635_v5 }
 0x2d2   : > { %900 = vmatmul.msk.f32.vlgmr.msrb.gmra.mxu2 %vm436_vm1, %v960_v56 }
 0x2d3   : > { %v715_v6 = vpop.permute.xlu0 %714 }
 0x2d4   : > { %735 = vmatpush.msra.mxu0 %v715_v6 }
 0x2d5   : > { %903 = vmatmul.msk.f32.vlgmr.msra.gmra.mxu0 %vm436_vm1, %v964_v2 }
 0x2fe   : > { %v633_v7 = vpop.xlane.xlu0 %632 }
 0x2ff   : > { %v660_v8 = vmax.f32 %v633_v7, 1e-30 }
 0x301   : > { %965 = vrcp.f32 %v660_v8  ;;  %v672_v36 = vand.u32 2147483648, %v660_v8  ;;  %vm666_vm10 = vweird.f32 %v660_v8  ;;  %v670_v37 = vand.u32 2147483647, %v660_v8 }
 0x303   : > { %v673_v43 = vor.u32 1.1754944e-38, %v672_v36  ;;  %vm671_vm15 = vcmp.eq.f32.partialorder %v670_v37, 8.507059e+37 }
 0x307   : > { %v966_v11 = vpop.eup %965 }
 0x308   : > { %v662_v16 = vmul.f32 %v966_v11, %v660_v8  ;;  %vm667_vm8 = vweird.f32 %v966_v11 }
 0x309   : > { %vm668_vm12 = vmor %vm666_vm10, %vm667_vm8 }
 0x30a   : > { %v663_v21 = vsub.f32 1.0, %v662_v16 }
 0x30c   : > { %v664_v27 = vmul.f32 %v966_v11, %v663_v21 }
 0x30e   : > { %v665_v33 = vadd.f32 %v966_v11, %v664_v27 }
 0x310   : > { %v669_v41 = vsel %vm668_vm12, %v966_v11, %v665_v33 }
 0x311   : > { %v674_v48 = vsel %vm671_vm15, %v673_v43, %v669_v41 }
 0x338   : > { %v552_v9 = vpop.xlane.xlu2 %551 }
 0x339   : > { %v580_v10 = vmax.f32 %v552_v9, 1e-30 }
 0x33b   : > { %967 = vrcp.f32 %v580_v10  ;;  %v592_v18 = vand.u32 2147483648, %v580_v10  ;;  %v590_v20 = vand.u32 2147483647, %v580_v10  ;;  %vm586_vm5 = vweird.f32 %v580_v10 }
 0x33d   : > { %v593_v23 = vor.u32 1.1754944e-38, %v592_v18  ;;  %vm591_vm7 = vcmp.eq.f32.partialorder %v590_v20, 8.507059e+37 }
 0x340   : > { %v713_v12 = vpop.xlane.xlu1 %712  ;;  %v475_v50 = vpop.xlane.xlu2 %474 }
 0x341   : > { %v968_v13 = vpop.eup %967  ;;  %v740_v14 = vmax.f32 %v713_v12, 1e-30  ;;  %v577_v25 = vpop.f32.mrf.mxu0  ;;  %v499_v51 = vmax.f32 %v475_v50, 1e-30 }
 0x342   : > { %v582_v15 = vmul.f32 %v968_v13, %v580_v10  ;;  %vm587_vm4 = vweird.f32 %v968_v13 }
 0x343   : > { %969 = vrcp.f32 %v740_v14  ;;  %vm588_vm6 = vmor %vm586_vm5, %vm587_vm4  ;;  %v752_v32 = vand.u32 2147483648, %v740_v14  ;;  %v750_v35 = vand.u32 2147483647, %v740_v14  ;;  %vm746_vm11 = vweird.f32 %v740_v14 }
 0x344   : > { %v583_v17 = vsub.f32 1.0, %v582_v15  ;;  %971 = vrcp.f32 %v499_v51  ;;  %v511_v57 = vand.u32 2147483648, %v499_v51  ;;  %vm505_vm3 = vweird.f32 %v499_v51 }
 0x345   : > { %v753_v40 = vor.u32 1.1754944e-38, %v752_v32  ;;  %vm751_vm14 = vcmp.eq.f32.partialorder %v750_v35, 8.507059e+37  ;;  %v509_v58 = vand.u32 2147483647, %v499_v51 }
 0x346   : > { %v584_v19 = vmul.f32 %v968_v13, %v583_v17  ;;  %v512_v60 = vor.u32 1.1754944e-38, %v511_v57 }
 0x347   : > { %vm510_vm5 = vcmp.eq.f32.partialorder %v509_v58, 8.507059e+37 }
 0x348   : > { %v585_v22 = vadd.f32 %v968_v13, %v584_v19 }
 0x349   : > { %v970_v24 = vpop.eup %969 }
 0x34a   : > { %v589_v26 = vsel %vm588_vm6, %v968_v13, %v585_v22  ;;  %v742_v29 = vmul.f32 %v970_v24, %v740_v14  ;;  %vm747_vm9 = vweird.f32 %v970_v24  ;;  %v972_v52 = vpop.eup %971  ;;  %vm769_vm6 = vcmask 130048  }
 0x34b   : > { %v594_v28 = vsel %vm591_vm7, %v593_v23, %v589_v26  ;;  %vm748_vm13 = vmor %vm746_vm11, %vm747_vm9  ;;  %v501_v53 = vmul.f32 %v972_v52, %v499_v51  ;;  %vm506_vm2 = vweird.f32 %v972_v52  ;;  %vm771_vm7 = vcmask 195584  }
 0x34c   : > { %v595_v30 = vmul.f32 %v594_v28, %v577_v25  ;;  %v743_v31 = vsub.f32 1.0, %v742_v29  ;;  %vm507_vm4 = vmor %vm505_vm3, %vm506_vm2 }
 0x34d   : > { %v502_v54 = vsub.f32 1.0, %v501_v53 }
 0x34e   : > { %757 = vrot.lane.b32.xlu0 %v595_v30, %s1042_s9  ;;  %v744_v34 = vmul.f32 %v970_v24, %v743_v31 }
 0x34f   : > { %v503_v55 = vmul.f32 %v972_v52, %v502_v54 }
 0x350   : > { %v745_v38 = vadd.f32 %v970_v24, %v744_v34 }
 0x351   : > { %v504_v56 = vadd.f32 %v972_v52, %v503_v55 }
 0x352   : > { %v737_v39 = vpop.f32.mrf.mxu0  ;;  %v749_v42 = vsel %vm748_vm13, %v970_v24, %v745_v38 }
 0x353   : > { %v754_v44 = vsel %vm751_vm14, %v753_v40, %v749_v42  ;;  %v508_v59 = vsel %vm507_vm4, %v972_v52, %v504_v56 }
 0x354   : > { %v755_v45 = vmul.f32 %v754_v44, %v737_v39  ;;  %v513_v61 = vsel %vm510_vm5, %v512_v60, %v508_v59 }
 0x355   : > { %v657_v46 = vpop.f32.mrf.mxu2  ;;  %v514_v63 = vmul.f32 %v513_v61, %v1231_v47 }
 0x356   : > { %v675_v49 = vmul.f32 %v674_v48, %v657_v46  ;;  %765 = vrot.lane.b32.xlu2 %v755_v45, %s1043_s15 }
 0x358   : > { %761 = vrot.lane.b32.xlu1 %v675_v49, %s1044_s16  ;;  %s993_s16 = scalar_lea.hbm %s1290_s7, 16 }
 0x359   : > { %p995_p1 = scmp.lt.s32.totalorder %s993_s16, %s989_s21 }
 0x35b   : > { %p996_p2 = por %p995_p1, %p994_p0 }
 0x35d   : > { %p997_p3 = pnand %p996_p2, %p992_p13 }
 0x3b0   : > { %v766_v2 = vpop.permute.xlu2 %765 }
 0x3c0   : > { %v758_v62 = vpop.permute.xlu0 %757 }
 0x3c1   : > { %v768_v0 = vsel %vm436_vm1, %v514_v63, %v758_v62 }
 0x3ca   : > { %v762_v1 = vpop.permute.xlu1 %761 }
 0x3cb   : > { %v770_v3 = vsel %vm769_vm6, %v768_v0, %v762_v1 }
 0x3cc   : > { %v772_v4 = vsel %vm771_vm7, %v770_v3, %v766_v2 }
 0x3cd   : > { %773 = vst.msk [vmem:[%s293_s8] sm:$0xff] %vm315_vm0, %v772_v4 }
 0x3ce   : > { %1000 = shalt.err (!%p997_p3)
}
 0x3cf   : > { %908 = dma.vmem_to_hbm [thread:$0]  (%p1123_p5), %s788_s13, 128, %s790_s14, %s775_s28  }
 0x3d0 PF: > { %p914_p4 = scmp.ge.s32.totalorder %s1035_s27, 2  ;;  %s801_s18 = sand.u32 1, %s1023_s24  }
 0x3d1   : > { %s802_s22 = scalar_lea.sflag [#allocation3], %s801_s18 }
 0x3d2   : > { %p911_p7 = pnand %p914_p4, %p1127_p6 }
 0x3d4   : > { %p912_p8 = pneg %p911_p7 }
 0x3d6   : > { %1018 = dma.done.wait (%p912_p8), %s802_s22, 128  }
 0x3d7   : > { %1020 = vsyncadd (%p912_p8), %s802_s22, 4294967168  ;;  %p17_p9 = scmp.ge.s32.totalorder %s1110_s30, 4   ;;  %s1295_s24 = smov %s1027_s25 }
 0x3d8   : > { %s1296_s25 = smov %s1031_s26  ;;  %s1297_s26 = smov %s1121_s10 }
 0x3d9   : > { %s1298_s27 = smov %s1110_s30  ;;  %19 = sbr.rel (!%p17_p9) target bundleno = 3 (0x3), region = 89 }
 0x3de   :  { %808 = vsyncpa [#allocation3], 1 }
 0x3df   :  { %810 = vsyncpa [#allocation3 + $0x1], 1 }

</bundles_post_ra>
